<compile_context>
chip_gen: v5e
topology: v5e:2x2
jax: 0.10.0
libtpu: 0.0.40
codegen_flags: <defaults>
</compile_context>

<pallas_src>
import functools

import jax
import jax.numpy as jnp
from jax.experimental import pallas as pl
from jax.experimental.pallas import tpu as pltpu


def _round_up(v, m):
    return ((v + m - 1) // m) * m


def _global_sa_kernel(seg_starts_ref, first_ref, last_ref,
                      feat_ref, w1_ref, b1_ref, w2_ref, b2_ref,
                      out_ref, *, tile_n, num_batches):
    """One tile of points: fused per-point MLP + partial segmented max."""
    i = pl.program_id(0)

    # Output block is resident across the whole grid -> it is the accumulator.
    @pl.when(i == 0)
    def _():
        out_ref[...] = jnp.full(out_ref.shape, -jnp.inf, dtype=out_ref.dtype)

    # ---- per-point MLP: relu(feat @ W1 + b1) @ W2 + b2, relu (bf16 MXU, f32 acc) ----
    h = jnp.dot(feat_ref[...], w1_ref[...], preferred_element_type=jnp.float32)
    h = jnp.maximum(h + b1_ref[...], 0.0)
    y = jnp.dot(h.astype(w2_ref.dtype), w2_ref[...],
                preferred_element_type=jnp.float32)
    y = jnp.maximum(y + b2_ref[...], 0.0)                       # [tile_n, C_pad] f32

    # ---- partial segmented max: loop only over segments present in this tile ----
    # Rows of segment s are those with global index in [seg_starts[s], seg_starts[s+1]);
    # padded rows (global index >= N) never fall inside any segment range.
    gidx = i * tile_n + jax.lax.broadcasted_iota(jnp.int32, (tile_n, 1), 0)
    out_rows = jax.lax.broadcasted_iota(jnp.int32, (num_batches, 1), 0)

    def seg_body(s, carry):
        lo = seg_starts_ref[s]
        hi = seg_starts_ref[s + 1]
        in_seg = (gidx >= lo) & (gidx < hi)                     # (tile_n, 1)
        part = jnp.max(jnp.where(in_seg, y, -jnp.inf),
                       axis=0, keepdims=True)                   # (1, C_pad)
        upd = jnp.where(out_rows == s, part, -jnp.inf)          # (B, C_pad)
        out_ref[...] = jnp.maximum(out_ref[...], upd)
        return carry

    jax.lax.fori_loop(first_ref[i], last_ref[i] + 1, seg_body, 0)


def global_sa_module(x, pos, batch, params, num_batches, *,
                     tile_n=1024, compute_dtype=jnp.bfloat16):
    """Pallas implementation of GlobalSAModule.forward (nn = Linear-ReLU-Linear-ReLU)."""
    N, Cx = x.shape
    P = pos.shape[1]                       # 3
    w1, b1, w2, b2 = params
    K = Cx + P
    H = w1.shape[1]
    Cout = w2.shape[1]

    LANE = 128
    K_pad = _round_up(K, 8)                # sublane-align the contraction dim
    H_pad = _round_up(H, LANE)             # lane-dense hidden
    C_pad = _round_up(Cout, LANE)          # lane-dense output (unmasked vst)

    tile_n = max(LANE, _round_up(int(tile_n), LANE))
    n_tiles = pl.cdiv(N, tile_n)
    N_pad = n_tiles * tile_n

    # ---- wrapper-side glue: fuse the concat, pad, cast to the MXU compute dtype ----
    feat = jnp.concatenate([x, pos], axis=1)                        # [N, K]
    feat = jnp.pad(feat, ((0, N_pad - N), (0, K_pad - K)))          # zero rows/cols
    feat = feat.astype(compute_dtype)

    batch = batch.astype(jnp.int32)
    # Segment boundaries of the sorted batch vector; seg_starts[B] == N.
    seg_starts = jnp.searchsorted(
        batch, jnp.arange(num_batches + 1, dtype=jnp.int32)).astype(jnp.int32)
    starts = jnp.arange(n_tiles, dtype=jnp.int32) * tile_n
    first_seg = batch[jnp.minimum(starts, N - 1)]                   # first segment in tile
    last_seg = batch[jnp.minimum(starts + tile_n, N) - 1]           # last segment in tile

    w1p = jnp.pad(w1, ((0, K_pad - K), (0, H_pad - H))).astype(compute_dtype)
    b1p = jnp.pad(b1, (0, H_pad - H)).reshape(1, H_pad).astype(jnp.float32)
    w2p = jnp.pad(w2, ((0, H_pad - H), (0, C_pad - Cout))).astype(compute_dtype)
    b2p = jnp.pad(b2, (0, C_pad - Cout)).reshape(1, C_pad).astype(jnp.float32)

    kernel = functools.partial(_global_sa_kernel, tile_n=tile_n,
                               num_batches=num_batches)

    # ---- explicit VMEM budget (<=32 MiB so it also fits v7x's 64 MiB/TC) ----
    isz = jnp.dtype(compute_dtype).itemsize
    est = (2 * tile_n * K_pad * isz                      # double-buffered feat tiles
           + 2 * (K_pad * H_pad + H_pad * C_pad) * isz   # weights
           + 2 * (H_pad + C_pad) * 4                     # biases
           + 2 * num_batches * C_pad * 4                 # output accumulator block
           + tile_n * (H_pad + C_pad) * 4                # h, y intermediates
           + 2 * num_batches * C_pad * 4)                # per-segment update temporaries
    vmem_limit = int(min(32 * 1024 * 1024, max(8 * 1024 * 1024, 2 * est)))

    flops = 2 * N_pad * (K_pad * H_pad + H_pad * C_pad)
    bytes_accessed = int(N_pad * K_pad * isz
                         + (K_pad * H_pad + H_pad * C_pad) * isz
                         + (H_pad + C_pad) * 4
                         + num_batches * C_pad * 4)
    cost = pl.CostEstimate(flops=int(flops), transcendentals=0,
                           bytes_accessed=bytes_accessed)

    out_padded = pl.pallas_call(
        kernel,
        out_shape=jax.ShapeDtypeStruct((num_batches, C_pad), jnp.float32),
        grid_spec=pltpu.PrefetchScalarGridSpec(
            num_scalar_prefetch=3,                       # seg_starts, first_seg, last_seg
            grid=(n_tiles,),
            in_specs=[
                # per-point features, tiled along N (software-pipelined)
                pl.BlockSpec((tile_n, K_pad), lambda i, ss, fs, ls: (i, 0)),
                # weights / biases: constant index_map -> stay resident in VMEM
                pl.BlockSpec((K_pad, H_pad), lambda i, ss, fs, ls: (0, 0)),
                pl.BlockSpec((1, H_pad), lambda i, ss, fs, ls: (0, 0)),
                pl.BlockSpec((H_pad, C_pad), lambda i, ss, fs, ls: (0, 0)),
                pl.BlockSpec((1, C_pad), lambda i, ss, fs, ls: (0, 0)),
            ],
            out_specs=pl.BlockSpec((num_batches, C_pad), lambda i, ss, fs, ls: (0, 0)),
        ),
        compiler_params=pltpu.CompilerParams(
            dimension_semantics=("arbitrary",),          # reduction over point tiles
            vmem_limit_bytes=vmem_limit,
        ),
        cost_estimate=cost,
    )(seg_starts, first_seg, last_seg, feat, w1p, b1p, w2p, b2p)

    out = out_padded[:, :Cout]                           # drop channel padding
    pos_out = jnp.zeros((num_batches, P), dtype=pos.dtype)
    batch_out = jnp.arange(num_batches, dtype=jnp.int32)
    return out, pos_out, batch_out


def _reference(x, pos, batch, params, num_batches):
    w1, b1, w2, b2 = params
    feat = jnp.concatenate([x, pos], axis=1)
    h = jnp.maximum(feat @ w1 + b1, 0.0)
    y = jnp.maximum(h @ w2 + b2, 0.0)
    out = jnp.stack([
        jnp.max(jnp.where((batch == b)[:, None], y, -jnp.inf), axis=0)
        for b in range(num_batches)
    ])
    return out


if __name__ == "__main__":
    key = jax.random.PRNGKey(0)
    k_x, k_pos, k_w1, k_b1, k_w2, k_b2 = jax.random.split(key, 6)

    # small shapes: N=300 points (non-multiple of the tile -> exercises padding),
    # Cx=4 features, 3-D pos, B=3 graphs, MLP([Cx+3, 32, 32]).
    N, Cx, P, B = 300, 4, 3, 3
    H, Cout = 32, 32

    x = jax.random.normal(k_x, (N, Cx), dtype=jnp.float32)
    pos = jax.random.normal(k_pos, (N, P), dtype=jnp.float32)
    # PyG-style sorted batch vector with uneven segment sizes
    batch = jnp.concatenate([
        jnp.full((100,), 0, dtype=jnp.int32),
        jnp.full((120,), 1, dtype=jnp.int32),
        jnp.full((80,), 2, dtype=jnp.int32),
    ])

    # deterministic synthetic MLP parameters (the `nn` passed to __init__)
    w1 = jax.random.normal(k_w1, (Cx + P, H), dtype=jnp.float32) * 0.1
    b1 = jax.random.normal(k_b1, (H,), dtype=jnp.float32) * 0.1
    w2 = jax.random.normal(k_w2, (H, Cout), dtype=jnp.float32) * 0.1
    b2 = jax.random.normal(k_b2, (Cout,), dtype=jnp.float32) * 0.1
    params = (w1, b1, w2, b2)

    ref = _reference(x, pos, batch, params, B)

    # 1) f32 compute path (tile_n=128 -> grid (3,), exercises cross-tile accumulation and
    #    tiles spanning two segments), exact-ish tolerance.
    out32, pos_out, batch_out = global_sa_module(
        x, pos, batch, params, B, tile_n=128, compute_dtype=jnp.float32)
    out32 = jax.block_until_ready(out32)
    jax.block_until_ready(pos_out)
    jax.block_until_ready(batch_out)

    assert out32.shape == (B, Cout)
    assert pos_out.shape == (B, P) and jnp.all(pos_out == 0)
    assert jnp.array_equal(batch_out, jnp.arange(B, dtype=jnp.int32))
    assert jnp.allclose(out32, ref, atol=1e-4, rtol=1e-4), "f32 mismatch vs reference"

    # 2) bf16 MXU path (the production default), looser tolerance.
    out16, _, _ = global_sa_module(
        x, pos, batch, params, B, tile_n=128, compute_dtype=jnp.bfloat16)
    out16 = jax.block_until_ready(out16)
    assert jnp.allclose(out16, ref, atol=3e-2, rtol=3e-2), "bf16 mismatch vs reference"

    print("KERNEL_OK")
</pallas_src>

<mosaic_0001>
module attributes {stable_mosaic.version = 11 : i64} {
  func.func @_global_sa_kernel(%arg0: i32, %arg1: memref<4xi32, #tpu.memory_space<smem>>, %arg2: memref<3xi32, #tpu.memory_space<smem>>, %arg3: memref<3xi32, #tpu.memory_space<smem>>, %arg4: memref<128x8xf32, #tpu.memory_space<vmem>>, %arg5: memref<8x128xf32, #tpu.memory_space<vmem>>, %arg6: memref<1x128xf32, #tpu.memory_space<vmem>>, %arg7: memref<128x128xf32, #tpu.memory_space<vmem>>, %arg8: memref<1x128xf32, #tpu.memory_space<vmem>>, %arg9: memref<3x128xf32, #tpu.memory_space<vmem>>) attributes {dimension_semantics = [#tpu.dimension_semantics<arbitrary>], iteration_bounds = array<i64: 3>, scalar_prefetch = 3 : i64, scratch_operands = 0 : i64, tpu.core_type = #tpu.core_type<tc>, window_params = [{transform_indices = @transform_0, window_bounds = array<i64: 128, 8>}, {pipeline_mode = #tpu.pipeline_mode<synchronous>, transform_indices = @transform_1, window_bounds = array<i64: 8, 128>}, {pipeline_mode = #tpu.pipeline_mode<synchronous>, transform_indices = @transform_2, window_bounds = array<i64: 1, 128>}, {pipeline_mode = #tpu.pipeline_mode<synchronous>, transform_indices = @transform_3, window_bounds = array<i64: 128, 128>}, {pipeline_mode = #tpu.pipeline_mode<synchronous>, transform_indices = @transform_4, window_bounds = array<i64: 1, 128>}, {pipeline_mode = #tpu.pipeline_mode<synchronous>, transform_indices = @transform_5, window_bounds = array<i64: 3, 128>}]} {
    %c0_i32 = arith.constant 0 : i32
    %0 = arith.cmpi eq, %arg0, %c0_i32 : i32
    %1 = arith.extui %0 : i1 to i32
    %c0_i32_0 = arith.constant 0 : i32
    %2 = arith.cmpi ne, %1, %c0_i32_0 : i32
    scf.if %2 {
      %cst_15 = arith.constant 0xFF800000 : f32
      %30 = vector.broadcast %cst_15 : f32 to vector<3x128xf32>
      %c0_16 = arith.constant 0 : index
      %c0_17 = arith.constant 0 : index
      %31 = vector.load %arg9[%c0_16, %c0_17] : memref<3x128xf32, #tpu.memory_space<vmem>>, vector<3x128xf32>
      tpu.vector_store %arg9[%c0_16, %c0_17], %30 {strides = array<i32>} : memref<3x128xf32, #tpu.memory_space<vmem>>, vector<3x128xf32>,
    } else {
    }
    %c0 = arith.constant 0 : index
    %c0_1 = arith.constant 0 : index
    %3 = vector.load %arg4[%c0, %c0_1] : memref<128x8xf32, #tpu.memory_space<vmem>>, vector<128x8xf32>
    %c0_2 = arith.constant 0 : index
    %c0_3 = arith.constant 0 : index
    %4 = vector.load %arg5[%c0_2, %c0_3] : memref<8x128xf32, #tpu.memory_space<vmem>>, vector<8x128xf32>
    %cst = arith.constant dense<0.000000e+00> : vector<128x128xf32>
    %5 = tpu.matmul %3, %4, %cst {dimension_numbers = #tpu.dot_dimension_numbers<[1], [0], [0], [1], [0, 0, 1, 1], [], []>} : vector<128x8xf32>, vector<8x128xf32>, vector<128x128xf32> -> vector<128x128xf32>
    %c0_4 = arith.constant 0 : index
    %c0_5 = arith.constant 0 : index
    %6 = vector.load %arg6[%c0_4, %c0_5] : memref<1x128xf32, #tpu.memory_space<vmem>>, vector<1x128xf32>
    %7 = vector.broadcast %6 : vector<1x128xf32> to vector<128x128xf32>
    %8 = arith.addf %5, %7 : vector<128x128xf32>
    %cst_6 = arith.constant 0.000000e+00 : f32
    %9 = vector.broadcast %cst_6 : f32 to vector<128x128xf32>
    %10 = arith.maximumf %8, %9 : vector<128x128xf32>
    %c0_7 = arith.constant 0 : index
    %c0_8 = arith.constant 0 : index
    %11 = vector.load %arg7[%c0_7, %c0_8] : memref<128x128xf32, #tpu.memory_space<vmem>>, vector<128x128xf32>
    %cst_9 = arith.constant dense<0.000000e+00> : vector<128x128xf32>
    %12 = tpu.matmul %10, %11, %cst_9 {dimension_numbers = #tpu.dot_dimension_numbers<[1], [0], [0], [1], [0, 0, 1, 1], [], []>} : vector<128x128xf32>, vector<128x128xf32>, vector<128x128xf32> -> vector<128x128xf32>
    %c0_10 = arith.constant 0 : index
    %c0_11 = arith.constant 0 : index
    %13 = vector.load %arg8[%c0_10, %c0_11] : memref<1x128xf32, #tpu.memory_space<vmem>>, vector<1x128xf32>
    %14 = vector.broadcast %13 : vector<1x128xf32> to vector<128x128xf32>
    %15 = arith.addf %12, %14 : vector<128x128xf32>
    %cst_12 = arith.constant 0.000000e+00 : f32
    %16 = vector.broadcast %cst_12 : f32 to vector<128x128xf32>
    %17 = arith.maximumf %15, %16 : vector<128x128xf32>
    %c128_i32 = arith.constant 128 : i32
    %18 = arith.muli %arg0, %c128_i32 : i32
    %19 = tpu.iota {dimensions = array<i32: 0>} : vector<128x1xi32>
    %20 = vector.broadcast %18 : i32 to vector<128x1xi32>
    %21 = arith.addi %20, %19 : vector<128x1xi32>
    %22 = tpu.iota {dimensions = array<i32: 0>} : vector<3x1xi32>
    %23 = arith.index_cast %arg0 : i32 to index
    %24 = memref.load %arg2[%23] : memref<3xi32, #tpu.memory_space<smem>>
    %25 = arith.index_cast %arg0 : i32 to index
    %26 = memref.load %arg3[%25] : memref<3xi32, #tpu.memory_space<smem>>
    %c1_i32 = arith.constant 1 : i32
    %27 = arith.addi %26, %c1_i32 : i32
    %c0_i32_13 = arith.constant 0 : i32
    %28 = arith.subi %27, %24 : i32
    %29 = arith.addi %24, %28 : i32
    %c1_i32_14 = arith.constant 1 : i32
    scf.for %arg10 = %24 to %29 step %c1_i32_14  : i32 {
      %30 = arith.index_cast %arg10 : i32 to index
      %31 = memref.load %arg1[%30] : memref<4xi32, #tpu.memory_space<smem>>
      %c1_i32_15 = arith.constant 1 : i32
      %32 = arith.addi %arg10, %c1_i32_15 : i32
      %33 = arith.index_cast %32 : i32 to index
      %34 = memref.load %arg1[%33] : memref<4xi32, #tpu.memory_space<smem>>
      %35 = vector.broadcast %31 : i32 to vector<128x1xi32>
      %36 = arith.cmpi sge, %21, %35 : vector<128x1xi32>
      %37 = vector.broadcast %34 : i32 to vector<128x1xi32>
      %38 = arith.cmpi slt, %21, %37 : vector<128x1xi32>
      %39 = arith.andi %36, %38 : vector<128x1xi1>
      %cst_16 = arith.constant 0xFF800000 : f32
      %40 = vector.shape_cast %39 : vector<128x1xi1> to vector<128x1xi1>
      %41 = vector.broadcast %40 : vector<128x1xi1> to vector<128x128xi1>
      %42 = vector.broadcast %cst_16 : f32 to vector<128x128xf32>
      %43 = arith.select %41, %17, %42 : vector<128x128xi1>, vector<128x128xf32>
      %cst_17 = arith.constant dense<0xFF800000> : vector<128xf32>
      %44 = vector.multi_reduction <maximumf>, %43, %cst_17 [0] : vector<128x128xf32> to vector<128xf32>
      %45 = vector.shape_cast %44 : vector<128xf32> to vector<1x128xf32>
      %46 = vector.broadcast %arg10 : i32 to vector<3x1xi32>
      %47 = arith.cmpi eq, %22, %46 : vector<3x1xi32>
      %cst_18 = arith.constant 0xFF800000 : f32
      %48 = vector.shape_cast %47 : vector<3x1xi1> to vector<3x1xi1>
      %49 = vector.broadcast %48 : vector<3x1xi1> to vector<3x128xi1>
      %50 = vector.shape_cast %45 : vector<1x128xf32> to vector<1x128xf32>
      %51 = vector.broadcast %50 : vector<1x128xf32> to vector<3x128xf32>
      %52 = vector.broadcast %cst_18 : f32 to vector<3x128xf32>
      %53 = arith.select %49, %51, %52 : vector<3x128xi1>, vector<3x128xf32>
      %c0_19 = arith.constant 0 : index
      %c0_20 = arith.constant 0 : index
      %54 = vector.load %arg9[%c0_19, %c0_20] : memref<3x128xf32, #tpu.memory_space<vmem>>, vector<3x128xf32>
      %55 = arith.maximumf %54, %53 : vector<3x128xf32>
      %c0_21 = arith.constant 0 : index
      %c0_22 = arith.constant 0 : index
      %56 = vector.load %arg9[%c0_21, %c0_22] : memref<3x128xf32, #tpu.memory_space<vmem>>, vector<3x128xf32>
      tpu.vector_store %arg9[%c0_21, %c0_22], %55 {strides = array<i32>} : memref<3x128xf32, #tpu.memory_space<vmem>>, vector<3x128xf32>,
    }
    return
  }
  func.func @transform_0(%arg0: i32, %arg1: memref<4xi32, #tpu.memory_space<smem>>, %arg2: memref<3xi32, #tpu.memory_space<smem>>, %arg3: memref<3xi32, #tpu.memory_space<smem>>) -> (i32, i32) {
    %c0_i32 = arith.constant 0 : i32
    %c0_i32_0 = arith.constant 0 : i32
    return %arg0, %c0_i32 : i32, i32
  }
  func.func @transform_1(%arg0: i32, %arg1: memref<4xi32, #tpu.memory_space<smem>>, %arg2: memref<3xi32, #tpu.memory_space<smem>>, %arg3: memref<3xi32, #tpu.memory_space<smem>>) -> (i32, i32) {
    %c0_i32 = arith.constant 0 : i32
    %c0_i32_0 = arith.constant 0 : i32
    %c0_i32_1 = arith.constant 0 : i32
    return %c0_i32, %c0_i32_0 : i32, i32
  }
  func.func @transform_2(%arg0: i32, %arg1: memref<4xi32, #tpu.memory_space<smem>>, %arg2: memref<3xi32, #tpu.memory_space<smem>>, %arg3: memref<3xi32, #tpu.memory_space<smem>>) -> (i32, i32) {
    %c0_i32 = arith.constant 0 : i32
    %c0_i32_0 = arith.constant 0 : i32
    %c0_i32_1 = arith.constant 0 : i32
    return %c0_i32, %c0_i32_0 : i32, i32
  }
  func.func @transform_3(%arg0: i32, %arg1: memref<4xi32, #tpu.memory_space<smem>>, %arg2: memref<3xi32, #tpu.memory_space<smem>>, %arg3: memref<3xi32, #tpu.memory_space<smem>>) -> (i32, i32) {
    %c0_i32 = arith.constant 0 : i32
    %c0_i32_0 = arith.constant 0 : i32
    %c0_i32_1 = arith.constant 0 : i32
    return %c0_i32, %c0_i32_0 : i32, i32
  }
  func.func @transform_4(%arg0: i32, %arg1: memref<4xi32, #tpu.memory_space<smem>>, %arg2: memref<3xi32, #tpu.memory_space<smem>>, %arg3: memref<3xi32, #tpu.memory_space<smem>>) -> (i32, i32) {
    %c0_i32 = arith.constant 0 : i32
    %c0_i32_0 = arith.constant 0 : i32
    %c0_i32_1 = arith.constant 0 : i32
    return %c0_i32, %c0_i32_0 : i32, i32
  }
  func.func @transform_5(%arg0: i32, %arg1: memref<4xi32, #tpu.memory_space<smem>>, %arg2: memref<3xi32, #tpu.memory_space<smem>>, %arg3: memref<3xi32, #tpu.memory_space<smem>>) -> (i32, i32) {
    %c0_i32 = arith.constant 0 : i32
    %c0_i32_0 = arith.constant 0 : i32
    %c0_i32_1 = arith.constant 0 : i32
    return %c0_i32, %c0_i32_0 : i32, i32
  }
}

</mosaic_0001>

<bundles_post_ra>
// kernel: tpu_custom_call.1
= control target key start
LH: loop header
LB: loop body
LE: loop exit
PB: predicated region body
PF: predicated region fallthrough
CT: control target
= control target key end

     0   :  { %s894_s11 = smov [#allocation3]   ;;  %s895_s12 = smov [#allocation4]   ;;  %s1354_s0 = inlined_call_operand.vmem [shape: s32[4], index: 0, kind: input, shape index: {}]   ;;  %s1355_s3 = inlined_call_operand.vmem [shape: f32[384,8], index: 3, kind: input, shape index: {}]   ;;  %s1356_s4 = inlined_call_operand.vmem [shape: f32[8,128], index: 4, kind: input, shape index: {}]   ;;  %s1357_s5 = inlined_call_operand.vmem [shape: f32[1,128], index: 5, kind: input, shape index: {}]   ;;  %s1358_s6 = inlined_call_operand.vmem [shape: f32[128,128], index: 6, kind: input, shape index: {}]   ;;  %s1359_s7 = inlined_call_operand.vmem [shape: f32[1,128], index: 7, kind: input, shape index: {}]   ;;  %s1360_s8 = inlined_call_operand.hbm [shape: f32[3,128], index: 8, kind: output, shape index: {}]   ;;  %s1361_s1 = inlined_call_operand.vmem [shape: s32[3], index: 1, kind: input, shape index: {}]   ;;  %s1362_s2 = inlined_call_operand.vmem [shape: s32[3], index: 2, kind: input, shape index: {}]  }
   0x1   :  { %s14_s29 = sshll.u32 %s1354_s0, 4  ;;  %s19_s10 = sshll.u32 %s1361_s1, 4  ;;  %s15_s29 = int_to_ptr.vmem [resolvable:$true] %s14_s29  ;;  %s20_s10 = int_to_ptr.vmem [resolvable:$true] %s19_s10 }
   0x2   :  { %17 = dma.vmem_to_smem %s15_s29, 16, %s894_s11, [#allocation2] }
   0x3   :  { %22 = dma.vmem_to_smem %s20_s10, 16, %s895_s12, [#allocation2] }
   0x4   :  { %s24_s15 = sshll.u32 %s1362_s2, 4  ;;  %s896_s16 = smov [#allocation5]   ;;  %s25_s15 = int_to_ptr.vmem [resolvable:$true] %s24_s15 }
   0x5   :  { %27 = dma.vmem_to_smem %s25_s15, 16, %s896_s16, [#allocation2] }
   0x6   :  { %880 = dma.done.wait [#allocation2], 48 }
   0x7   :  { %881 = vsyncadd [#allocation2], 4294967248 }
   0x8   :  { %30 = sfence }
   0x9   :  { %31 = vsyncpa [#allocation7], 0  ;;  %s953_s0 = smov 0  }
   0xa LB: > { %s959_s1 = sadd.s32 4294967295, %s888_s0   ;;  %p721_p0 = scmp.ge.s32.totalorder %s888_s0, 1  ;;  %s888_s0 = sphi %s953_s0, %s37_s0  }
   0xb   : > { %p205_p1 = scmp.lt.s32.totalorder %s888_s0, 4 }
   0xd   : > { %p206_p2 = pnand %p721_p0, %p205_p1 }
   0xe   : > { %s722_s2 = sshll.u32 (!%p206_p2), %s959_s1, 4  ;;  %p724_p4 = scmp.ne.s32.totalorder (!%p206_p2), %s959_s1, 0 }
   0xf   : > { %209 = sbr.rel (%p206_p2) target bundleno = 444 (0x1bc), region = 40  ;;  %p229_p3 = scmp.lt.s32.totalorder (!%p206_p2), %s722_s2, 47 }
  0x14   : > { %s1373_s2 = smov (!%p229_p3, %s722_s2), 47  ;;  %237 = sbr.rel (%p724_p4) target bundleno = 27 (0x1b), region = 44 }
  0x15   : > { %s723_s17 = sshll.u32 %s1373_s2, 3 }
  0x16   : > { %s967_s20 = scalar_lea.vmem %s1355_s3, %s723_s17 }
  0x19   : > { %v897_v0 = vmov -inf  }
  0x1a   : > { %238 = vst [vmem:[#allocation6] sm:$0x7] %v897_v0 }
  0x1b PF: > { %v255_v1 = vld [vmem:[%s1356_s4] sm:$0xff]  ;;  %vm260_vm0 = vcmask 64512   ;;  %v240_v3 = vld [vmem:[%s967_s20 + $0x8] sm:$0xff]  ;;  %v241_v4 = vld [vmem:[%s967_s20 + $0x10] sm:$0xff]  ;;  %s1057_s12 = sld [smem:[#allocation5 + %s959_s1]]  ;;  %s741_s2 = sshll.u32 %s959_s1, 7 }
  0x1c   : > { %v239_v2 = vld [vmem:[%s967_s20] sm:$0xff]  ;;  %324 = vmatpush.msra.mxu0 %v255_v1  ;;  %746 = vmatpush.msra.mxu3 %v255_v1  ;;  %v249_v5 = vld [vmem:[%s967_s20 + $0x50] sm:$0xff]  ;;  %v242_v6 = vld [vmem:[%s967_s20 + $0x18] sm:$0xff]  ;;  %s1060_s13 = sld [smem:[#allocation4 + %s959_s1]]  }
  0x1d   : > { %725 = vmatmul.msk.f32.vlgmr.msra.gmra.mxu0 %vm260_vm0, %v239_v2  ;;  %735 = vmatmul.msk.f32.vlgmr.msra.gmra.mxu3 %vm260_vm0, %v249_v5  ;;  %v250_v7 = vld [vmem:[%s967_s20 + $0x58] sm:$0xff]  ;;  %v243_v8 = vld [vmem:[%s967_s20 + $0x20] sm:$0xff]  ;;  %v244_v10 = vld [vmem:[%s967_s20 + $0x28] sm:$0xff] }
  0x1e   : > { %v251_v9 = vld [vmem:[%s967_s20 + $0x60] sm:$0xff]  ;;  %v252_v11 = vld [vmem:[%s967_s20 + $0x68] sm:$0xff]  ;;  %v405_v12 = vld [vmem:[%s1358_s6 + $0x78] sm:$0xff] }
  0x1f   : > { %v404_v13 = vld [vmem:[%s1358_s6 + $0x70] sm:$0xff]  ;;  %410 = vmatpush.msra.mxu1 %v405_v12  ;;  %747 = vmatpush.msra.mxu2 %v405_v12  ;;  %v403_v14 = vld [vmem:[%s1358_s6 + $0x68] sm:$0xff]  ;;  %v402_v16 = vld [vmem:[%s1358_s6 + $0x60] sm:$0xff] }
  0x20   : > { %748 = vmatpush.msrb.mxu3 %v405_v12  ;;  %v245_v15 = vld [vmem:[%s967_s20 + $0x30] sm:$0xff]  ;;  %v401_v18 = vld [vmem:[%s1358_s6 + $0x58] sm:$0xff]  ;;  %v399_v20 = vld [vmem:[%s1358_s6 + $0x48] sm:$0xff] }
  0x21   : > { %411 = vmatpush.msra.mxu1 %v404_v13  ;;  %749 = vmatpush.msra.mxu2 %v404_v13  ;;  %v253_v17 = vld [vmem:[%s967_s20 + $0x70] sm:$0xff]  ;;  %v246_v21 = vld [vmem:[%s967_s20 + $0x38] sm:$0xff]  ;;  %v398_v22 = vld [vmem:[%s1358_s6 + $0x40] sm:$0xff]  ;;  %s528_s14 = sadd.s32 1, %s1057_s12 }
  0x22   : > { %750 = vmatpush.msrb.mxu3 %v404_v13  ;;  %v400_v19 = vld [vmem:[%s1358_s6 + $0x50] sm:$0xff]  ;;  %v254_v23 = vld [vmem:[%s967_s20 + $0x78] sm:$0xff]  ;;  %v395_v26 = vld [vmem:[%s1358_s6 + $0x28] sm:$0xff]  ;;  %p697_p5 = scmp.ge.s32.totalorder %s1060_s13, %s528_s14 }
  0x23   : > { %412 = vmatpush.msra.mxu1 %v403_v14  ;;  %751 = vmatpush.msra.mxu2 %v403_v14  ;;  %v397_v24 = vld [vmem:[%s1358_s6 + $0x38] sm:$0xff]  ;;  %v396_v25 = vld [vmem:[%s1358_s6 + $0x30] sm:$0xff]  ;;  %v247_v27 = vld [vmem:[%s967_s20 + $0x40] sm:$0xff] }
  0x24   : > { %752 = vmatpush.msrb.mxu3 %v403_v14  ;;  %v394_v28 = vld [vmem:[%s1358_s6 + $0x20] sm:$0xff]  ;;  %v393_v29 = vld [vmem:[%s1358_s6 + $0x18] sm:$0xff]  ;;  %v248_v30 = vld [vmem:[%s967_s20 + $0x48] sm:$0xff] }
  0x25   : > { %726 = vmatmul.msk.f32.gmra.mxu0 %vm260_vm0, %v240_v3  ;;  %736 = vmatmul.msk.f32.gmra.mxu3 %vm260_vm0, %v250_v7  ;;  %v392_v31 = vld [vmem:[%s1358_s6 + $0x10] sm:$0xff]  ;;  %v391_v32 = vld [vmem:[%s1358_s6 + $0x8] sm:$0xff]  ;;  %v390_v33 = vld [vmem:[%s1358_s6] sm:$0xff] }
  0x26   : > { %413 = vmatpush.msra.mxu1 %v402_v16  ;;  %753 = vmatpush.msra.mxu2 %v402_v16  ;;  %v806_v34 = vld [vmem:[%s1357_s5] ss:$0 sm:$0xff] }
  0x27   : > { %754 = vmatpush.msrb.mxu3 %v402_v16 }
  0x28   : > { %414 = vmatpush.msra.mxu1 %v401_v18  ;;  %755 = vmatpush.msra.mxu2 %v401_v18 }
  0x29   : > { %756 = vmatpush.msrb.mxu3 %v401_v18 }
  0x2a   : > { %415 = vmatpush.msra.mxu1 %v400_v19  ;;  %757 = vmatpush.msra.mxu2 %v400_v19 }
  0x2b   : > { %758 = vmatpush.msrb.mxu3 %v400_v19  ;;  %v1066_v19 = vld [vmem:[%s1359_s7] ss:$0 sm:$0xff] }
  0x2c   : > { %416 = vmatpush.msra.mxu1 %v399_v20  ;;  %759 = vmatpush.msra.mxu2 %v399_v20 }
  0x2d   : > { %727 = vmatmul.msk.f32.gmra.mxu0 %vm260_vm0, %v241_v4  ;;  %737 = vmatmul.msk.f32.gmra.mxu3 %vm260_vm0, %v251_v9 }
  0x2e   : > { %417 = vmatpush.msra.mxu1 %v398_v22  ;;  %761 = vmatpush.msra.mxu2 %v398_v22 }
  0x2f   : > { %760 = vmatpush.msrb.mxu3 %v399_v20 }
  0x30   : > { %418 = vmatpush.msra.mxu1 %v397_v24  ;;  %763 = vmatpush.msra.mxu2 %v397_v24 }
  0x31   : > { %762 = vmatpush.msrb.mxu3 %v398_v22 }
  0x32   : > { %419 = vmatpush.msra.mxu1 %v396_v25  ;;  %765 = vmatpush.msra.mxu2 %v396_v25 }
  0x33   : > { %764 = vmatpush.msrb.mxu3 %v397_v24 }
  0x34   : > { %420 = vmatpush.msra.mxu1 %v395_v26  ;;  %767 = vmatpush.msra.mxu2 %v395_v26 }
  0x35   : > { %728 = vmatmul.msk.f32.gmra.mxu0 %vm260_vm0, %v242_v6  ;;  %738 = vmatmul.msk.f32.gmra.mxu3 %vm260_vm0, %v252_v11 }
  0x36   : > { %421 = vmatpush.msra.mxu1 %v394_v28  ;;  %769 = vmatpush.msra.mxu2 %v394_v28 }
  0x37   : > { %766 = vmatpush.msrb.mxu3 %v396_v25 }
  0x38   : > { %422 = vmatpush.msra.mxu1 %v393_v29  ;;  %771 = vmatpush.msra.mxu2 %v393_v29 }
  0x39   : > { %768 = vmatpush.msrb.mxu3 %v395_v26 }
  0x3a   : > { %423 = vmatpush.msra.mxu1 %v392_v31  ;;  %773 = vmatpush.msra.mxu2 %v392_v31 }
  0x3b   : > { %770 = vmatpush.msrb.mxu3 %v394_v28 }
  0x3c   : > { %424 = vmatpush.msra.mxu1 %v391_v32  ;;  %775 = vmatpush.msra.mxu2 %v391_v32 }
  0x3d   : > { %729 = vmatmul.msk.f32.gmra.mxu0 %vm260_vm0, %v243_v8  ;;  %739 = vmatmul.msk.f32.gmra.mxu3 %vm260_vm0, %v253_v17 }
  0x3e   : > { %772 = vmatpush.msrb.mxu3 %v393_v29  ;;  %425 = vmatpush.msra.mxu1 %v390_v33 }
  0x3f   : > { %777 = vmatpush.msra.mxu2 %v390_v33 }
  0x40   : > { %774 = vmatpush.msrb.mxu3 %v392_v31 }
  0x42   : > { %776 = vmatpush.msrb.mxu3 %v391_v32 }
  0x44   : > { %778 = vmatpush.msrb.mxu3 %v390_v33 }
  0x45   : > { %730 = vmatmul.msk.f32.gmra.mxu0 %vm260_vm0, %v244_v10  ;;  %740 = vmatmul.msk.f32.gmra.mxu3 %vm260_vm0, %v254_v23 }
  0x4d   : > { %731 = vmatmul.msk.f32.gmra.mxu0 %vm260_vm0, %v245_v15 }
  0x55   : > { %732 = vmatmul.msk.f32.gmra.mxu0 %vm260_vm0, %v246_v21 }
  0x5d   : > { %733 = vmatmul.msk.f32.gmra.mxu0 %vm260_vm0, %v247_v27 }
  0x65   : > { %734 = vmatmul.msk.f32.gmra.mxu0 %vm260_vm0, %v248_v30 }
  0x9a   : > { %v326_v35 = vpop.f32.mrf.mxu0 }
  0x9b   : > { %v327_v36 = vadd.f32 %v806_v34, %v326_v35 }
  0x9d   : > { %v374_v37 = vmax.f32 %v327_v36, 0.0 }
  0x9f   : > { %426 = vmatmul.f32.vlgmr.msra.gmra.mxu1 %v374_v37 }
  0xa0   : > { %v356_v45 = vpop.f32.mrf.mxu3 }
  0xa1   : > { %v357_v13 = vadd.f32 %v806_v34, %v356_v45 }
  0xa2   : > { %v329_v38 = vpop.f32.mrf.mxu0 }
  0xa3   : > { %v330_v39 = vadd.f32 %v806_v34, %v329_v38  ;;  %v384_v14 = vmax.f32 %v357_v13, 0.0 }
  0xa5   : > { %v375_v40 = vmax.f32 %v330_v39, 0.0 }
  0xa7   : > { %429 = vmatmul.f32.gmra.mxu1 %v375_v40 }
  0xa8   : > { %v359_v49 = vpop.f32.mrf.mxu3 }
  0xa9   : > { %v360_v15 = vadd.f32 %v806_v34, %v359_v49 }
  0xaa   : > { %v332_v41 = vpop.f32.mrf.mxu0 }
  0xab   : > { %v333_v42 = vadd.f32 %v806_v34, %v332_v41  ;;  %v385_v16 = vmax.f32 %v360_v15, 0.0 }
  0xad   : > { %v376_v43 = vmax.f32 %v333_v42, 0.0 }
  0xaf   : > { %432 = vmatmul.f32.gmra.mxu1 %v376_v43 }
  0xb0   : > { %v362_v53 = vpop.f32.mrf.mxu3 }
  0xb1   : > { %v363_v17 = vadd.f32 %v806_v34, %v362_v53 }
  0xb2   : > { %v335_v44 = vpop.f32.mrf.mxu0 }
  0xb3   : > { %v336_v46 = vadd.f32 %v806_v34, %v335_v44  ;;  %v386_v18 = vmax.f32 %v363_v17, 0.0 }
  0xb5   : > { %v377_v47 = vmax.f32 %v336_v46, 0.0 }
  0xb7   : > { %435 = vmatmul.f32.gmra.mxu1 %v377_v47 }
  0xb8   : > { %v365_v57 = vpop.f32.mrf.mxu3 }
  0xb9   : > { %v366_v59 = vadd.f32 %v806_v34, %v365_v57 }
  0xba   : > { %v338_v48 = vpop.f32.mrf.mxu0 }
  0xbb   : > { %v339_v50 = vadd.f32 %v806_v34, %v338_v48  ;;  %v387_v61 = vmax.f32 %v366_v59, 0.0 }
  0xbd   : > { %v378_v51 = vmax.f32 %v339_v50, 0.0  ;;  %465 = vmatmul.f32.vlgmr.msrb.gmra.mxu3 %v387_v61  ;;  %v492_v50 = vlaneseq }
  0xbf   : > { %438 = vmatmul.f32.gmra.mxu1 %v378_v51  ;;  %v1108_v51 = vshrl.u32 %v492_v50, 7 }
  0xc0   : > { %v368_v63 = vpop.f32.mrf.mxu3 }
  0xc1   : > { %v369_v1 = vadd.f32 %v806_v34, %v368_v63  ;;  %v495_v57 = vadd.s32 16, %v1108_v51  ;;  %v497_v59 = vadd.s32 32, %v1108_v51  ;;  %v499_v61 = vadd.s32 48, %v1108_v51 }
  0xc2   : > { %v341_v52 = vpop.f32.mrf.mxu0 }
  0xc3   : > { %v342_v54 = vadd.f32 %v806_v34, %v341_v52  ;;  %v388_v3 = vmax.f32 %v369_v1, 0.0  ;;  %v501_v1 = vadd.s32 64, %v1108_v51 }
  0xc5   : > { %v379_v55 = vmax.f32 %v342_v54, 0.0  ;;  %468 = vmatmul.f32.gmra.mxu3 %v388_v3  ;;  %v503_v3 = vadd.s32 80, %v1108_v51 }
  0xc7   : > { %441 = vmatmul.f32.gmra.mxu1 %v379_v55 }
  0xc8   : > { %v371_v5 = vpop.f32.mrf.mxu3 }
  0xc9   : > { %v372_v7 = vadd.f32 %v806_v34, %v371_v5  ;;  %v505_v5 = vadd.s32 96, %v1108_v51 }
  0xca   : > { %v344_v56 = vpop.f32.mrf.mxu0 }
  0xcb   : > { %v345_v58 = vadd.f32 %v806_v34, %v344_v56  ;;  %v389_v9 = vmax.f32 %v372_v7, 0.0  ;;  %v494_v56 = vadd.s32 8, %v1108_v51  ;;  %v507_v7 = vadd.s32 112, %v1108_v51 }
  0xcd   : > { %v380_v60 = vmax.f32 %v345_v58, 0.0  ;;  %471 = vmatmul.f32.gmra.mxu3 %v389_v9  ;;  %v496_v58 = vadd.s32 24, %v1108_v51  ;;  %v509_v9 = vstv %s741_s2 }
  0xcf   : > { %444 = vmatmul.f32.vlgmr.msra.gmra.mxu2 %v380_v60  ;;  %v498_v60 = vadd.s32 40, %v1108_v51  ;;  %v1141_v13 = vadd.s32 %v509_v9, %v496_v58 }
  0xd1   : > { %v1145_v15 = vadd.s32 %v509_v9, %v498_v60 }
  0xd2   : > { %v347_v62 = vpop.f32.mrf.mxu0 }
  0xd3   : > { %v348_v0 = vadd.f32 %v806_v34, %v347_v62 }
  0xd5   : > { %v381_v2 = vmax.f32 %v348_v0, 0.0  ;;  %v500_v0 = vadd.s32 56, %v1108_v51 }
  0xd7   : > { %447 = vmatmul.f32.gmra.mxu2 %v381_v2  ;;  %v502_v2 = vadd.s32 72, %v1108_v51  ;;  %v1149_v17 = vadd.s32 %v509_v9, %v500_v0 }
  0xda   : > { %v350_v4 = vpop.f32.mrf.mxu0 }
  0xdb   : > { %v351_v6 = vadd.f32 %v806_v34, %v350_v4  ;;  %v504_v4 = vadd.s32 88, %v1108_v51 }
  0xdd   : > { %v382_v8 = vmax.f32 %v351_v6, 0.0  ;;  %v506_v6 = vadd.s32 104, %v1108_v51 }
  0xdf   : > { %450 = vmatmul.f32.gmra.mxu2 %v382_v8  ;;  %v508_v8 = vadd.s32 120, %v1108_v51 }
  0xe2   : > { %v353_v10 = vpop.f32.mrf.mxu0 }
  0xe3   : > { %v354_v11 = vadd.f32 %v806_v34, %v353_v10  ;;  %v1135_v10 = vadd.s32 %v509_v9, %v1108_v51 }
  0xe5   : > { %v383_v12 = vmax.f32 %v354_v11, 0.0  ;;  %v1137_v11 = vadd.s32 %v509_v9, %v494_v56 }
  0xe7   : > { %453 = vmatmul.f32.gmra.mxu2 %v383_v12  ;;  %v1139_v12 = vadd.s32 %v509_v9, %v495_v57 }
  0xef   : > { %456 = vmatmul.f32.gmra.mxu2 %v384_v14  ;;  %v1143_v14 = vadd.s32 %v509_v9, %v497_v59 }
  0xf7   : > { %459 = vmatmul.f32.gmra.mxu2 %v385_v16  ;;  %v1147_v16 = vadd.s32 %v509_v9, %v499_v61 }
  0xff   : > { %462 = vmatmul.f32.gmra.mxu2 %v386_v18 }
 0x11c   : > { %v427_v20 = vpop.f32.mrf.mxu1 }
 0x11d   : > { %v1069_v21 = vadd.f32 %v1066_v19, %v427_v20  ;;  %v1151_v20 = vadd.s32 %v509_v9, %v501_v1 }
 0x124   : > { %v430_v23 = vpop.f32.mrf.mxu1 }
 0x125   : > { %v1073_v24 = vadd.f32 %v1066_v19, %v430_v23  ;;  %v1153_v23 = vadd.s32 %v509_v9, %v502_v2 }
 0x12c   : > { %v433_v26 = vpop.f32.mrf.mxu1 }
 0x12d   : > { %v1077_v27 = vadd.f32 %v1066_v19, %v433_v26  ;;  %v1155_v26 = vadd.s32 %v509_v9, %v503_v3 }
 0x134   : > { %v436_v29 = vpop.f32.mrf.mxu1 }
 0x135   : > { %v1081_v30 = vadd.f32 %v1066_v19, %v436_v29  ;;  %v1157_v29 = vadd.s32 %v509_v9, %v504_v4 }
 0x13c   : > { %v439_v32 = vpop.f32.mrf.mxu1 }
 0x13d   : > { %v1085_v33 = vadd.f32 %v1066_v19, %v439_v32 }
 0x140   : > { %v466_v39 = vpop.f32.mrf.mxu3 }
 0x141   : > { %v1096_v41 = vadd.f32 %v1066_v19, %v466_v39  ;;  %v1166_v39 = vadd.s32 %v509_v9, %v507_v7 }
 0x143   : > { %v488_v43 = vmax.f32 %v1096_v41, 0.0 }
 0x144   : > { %v442_v35 = vpop.f32.mrf.mxu1 }
 0x145   : > { %v1089_v36 = vadd.f32 %v1066_v19, %v442_v35  ;;  %v1162_v35 = vadd.s32 %v509_v9, %v505_v5 }
 0x148   : > { %v469_v45 = vpop.f32.mrf.mxu3 }
 0x149   : > { %v1104_v47 = vadd.f32 %v1066_v19, %v469_v45 }
 0x14b   : > { %v489_v49 = vmax.f32 %v1104_v47, 0.0 }
 0x150   : > { %v472_v53 = vpop.f32.mrf.mxu3 }
 0x151   : > { %v1114_v55 = vadd.f32 %v1066_v19, %v472_v53 }
 0x152   : > { %v445_v38 = vpop.f32.mrf.mxu2 }
 0x153   : > { %v1093_v40 = vadd.f32 %v1066_v19, %v445_v38  ;;  %v490_v63 = vmax.f32 %v1114_v55, 0.0  ;;  %v1164_v38 = vadd.s32 %v509_v9, %v506_v6 }
 0x15a   : > { %v448_v44 = vpop.f32.mrf.mxu2 }
 0x15b   : > { %v1101_v46 = vadd.f32 %v1066_v19, %v448_v44  ;;  %v1168_v44 = vadd.s32 %v509_v9, %v508_v8 }
 0x15d   : > { %v482_v48 = vmax.f32 %v1101_v46, 0.0 }
 0x162   : > { %v451_v52 = vpop.f32.mrf.mxu2 }
 0x163   : > { %v1111_v54 = vadd.f32 %v1066_v19, %v451_v52 }
 0x165   : > { %v483_v62 = vmax.f32 %v1111_v54, 0.0 }
 0x16a   : > { %v454_v18 = vpop.f32.mrf.mxu2 }
 0x16b   : > { %v1160_v32 = vadd.f32 %v1066_v19, %v454_v18 }
 0x16d   : > { %v484_v45 = vmax.f32 %v1160_v32, 0.0 }
 0x172   : > { %v457_v50 = vpop.f32.mrf.mxu2 }
 0x173   : > { %v1172_v52 = vadd.f32 %v1066_v19, %v457_v50 }
 0x175   : > { %v485_v53 = vmax.f32 %v1172_v52, 0.0 }
 0x17a   : > { %v460_v56 = vpop.f32.mrf.mxu2 }
 0x17b   : > { %v1176_v57 = vadd.f32 %v1066_v19, %v460_v56 }
 0x17d   : > { %v486_v58 = vmax.f32 %v1176_v57, 0.0 }
 0x181   : > { %698 = sbr.rel (%p697_p5) target bundleno = 438 (0x1b6), region = 72 }
 0x182   : > { %v463_v59 = vpop.f32.mrf.mxu2 }
 0x183   : > { %v1180_v60 = vadd.f32 %v1066_v19, %v463_v59 }
 0x185   : > { %v487_v61 = vmax.f32 %v1180_v60, 0.0 }
 0x186 LB: >> { %s535_s17 = sld [smem:[#allocation3 + %s892_s13]]  ;;  %s1194_s18 = sadd.s32 1, %s892_s13   ;;  %v1363_v22 = vmax.f32 %v1069_v21, 0.0  ;;  %v1364_v25 = vmax.f32 %v1073_v24, 0.0  ;;  %v1365_v28 = vmax.f32 %v1077_v27, 0.0  ;;  %v1366_v34 = vmax.f32 %v1085_v33, 0.0  ;;  %s892_s13 = sphi %s1060_s13, %s1371_s13  }
 0x187   : >> { %s537_s19 = sld [smem:[#allocation3 + %s1194_s18]]  ;;  %v1368_v31 = vmax.f32 %v1081_v30, 0.0  ;;  %v1369_v37 = vmax.f32 %v1089_v36, 0.0  ;;  %v1370_v42 = vmax.f32 %v1093_v40, 0.0  ;;  %p531_p6 = scmp.ge.s32.totalorder %s1194_s18, %s528_s14 }
 0x18c   : >> { %v1197_v19 = vstv %s535_s17 }
 0x18d   : >> { %vm539_vm1 = vcmp.ge.s32.totalorder %v1135_v10, %v1197_v19  ;;  %vm540_vm2 = vcmp.ge.s32.totalorder %v1137_v11, %v1197_v19  ;;  %v1203_v0 = vstv %s537_s19  ;;  %vm541_vm3 = vcmp.ge.s32.totalorder %v1139_v12, %v1197_v19 }
 0x18e   : >> { %vm556_vm4 = vcmp.lt.s32.totalorder %v1135_v10, %v1203_v0  ;;  %vm557_vm5 = vcmp.lt.s32.totalorder %v1137_v11, %v1203_v0  ;;  %vm558_vm6 = vcmp.lt.s32.totalorder %v1139_v12, %v1203_v0  ;;  %vm542_vm7 = vcmp.ge.s32.totalorder %v1141_v13, %v1197_v19 }
 0x18f   : >> { %vm559_vm8 = vcmp.lt.s32.totalorder %v1141_v13, %v1203_v0  ;;  %vm572_vm9 = vmand %vm539_vm1, %vm556_vm4  ;;  %vm543_vm10 = vcmp.ge.s32.totalorder %v1143_v14, %v1197_v19  ;;  %vm560_vm11 = vcmp.lt.s32.totalorder %v1143_v14, %v1203_v0  ;;  %vm544_vm13 = vcmp.ge.s32.totalorder %v1145_v15, %v1197_v19 }
 0x190   : >> { %vm573_vm12 = vmand %vm540_vm2, %vm557_vm5  ;;  %vm561_vm14 = vcmp.lt.s32.totalorder %v1145_v15, %v1203_v0  ;;  %vm562_vm1 = vcmp.lt.s32.totalorder %v1147_v16, %v1203_v0  ;;  %v620_v1 = vsel %vm572_vm9, %v1363_v22, -inf  ;;  %vm546_vm2 = vcmp.ge.s32.totalorder %v1149_v17, %v1197_v19 }
 0x191   : >> { %vm574_vm15 = vmand %vm541_vm3, %vm558_vm6  ;;  %vm547_vm5 = vcmp.ge.s32.totalorder %v1151_v20, %v1197_v19  ;;  %vm563_vm3 = vcmp.lt.s32.totalorder %v1149_v17, %v1203_v0  ;;  %v621_v2 = vsel %vm573_vm12, %v1364_v25, -inf  ;;  %vm548_vm0 = vcmp.ge.s32.totalorder %v1153_v23, %v1197_v19 }
 0x192   : >> { %vm575_vm4 = vmand %vm542_vm7, %vm559_vm8  ;;  %vm564_vm7 = vcmp.lt.s32.totalorder %v1151_v20, %v1203_v0  ;;  %v622_v3 = vsel %vm574_vm15, %v1365_v28, -inf  ;;  %vm565_vm9 = vcmp.lt.s32.totalorder %v1153_v23, %v1203_v0  ;;  %vm549_vm12 = vcmp.ge.s32.totalorder %v1155_v26, %v1197_v19 }
 0x193   : >> { %vm576_vm6 = vmand %vm543_vm10, %vm560_vm11  ;;  %vm1367_vm10 = vcmp.ge.s32.totalorder %v1147_v16, %v1197_v19  ;;  %v623_v5 = vsel %vm575_vm4, %v1368_v31, -inf  ;;  %vm550_vm15 = vcmp.ge.s32.totalorder %v1157_v29, %v1197_v19 }
 0x194   : >> { %vm577_vm8 = vmand %vm544_vm13, %vm561_vm14  ;;  %v624_v4 = vsel %vm576_vm6, %v1366_v34, -inf  ;;  %vm566_vm13 = vcmp.lt.s32.totalorder %v1155_v26, %v1203_v0  ;;  %v657_v34 = vstv %s892_s13  ;;  %s1371_s13 = smov %s1194_s18 }
 0x195   : >> { %vm578_vm11 = vmand %vm1367_vm10, %vm562_vm1  ;;  %v625_v6 = vsel %vm577_vm8, %v1369_v37, -inf  ;;  %v636_v7 = vmax.f32 %v620_v1, %v624_v4  ;;  %vm567_vm1 = vcmp.lt.s32.totalorder %v1157_v29, %v1203_v0 }
 0x196   : >> { %vm579_vm14 = vmand %vm546_vm2, %vm563_vm3  ;;  %v626_v8 = vsel %vm578_vm11, %v1370_v42, -inf  ;;  %v637_v9 = vmax.f32 %v621_v2, %v625_v6  ;;  %vm551_vm2 = vcmp.ge.s32.totalorder %v1162_v35, %v1197_v19  ;;  %vm568_vm3 = vcmp.lt.s32.totalorder %v1162_v35, %v1203_v0 }
 0x197   : >> { %vm580_vm4 = vmand %vm547_vm5, %vm564_vm7  ;;  %v627_v18 = vsel %vm579_vm14, %v482_v48, -inf  ;;  %v638_v50 = vmax.f32 %v622_v3, %v626_v8  ;;  %vm552_vm5 = vcmp.ge.s32.totalorder %v1164_v38, %v1197_v19  ;;  %vm569_vm7 = vcmp.lt.s32.totalorder %v1164_v38, %v1203_v0 }
 0x198   : >> { %vm581_vm6 = vmand %vm548_vm0, %vm565_vm9  ;;  %v628_v56 = vsel %vm580_vm4, %v483_v62, -inf  ;;  %v639_v59 = vmax.f32 %v623_v5, %v627_v18  ;;  %vm553_vm0 = vcmp.ge.s32.totalorder %v1166_v39, %v1197_v19  ;;  %vm570_vm9 = vcmp.lt.s32.totalorder %v1166_v39, %v1203_v0 }
 0x199   : >> { %vm582_vm8 = vmand %vm549_vm12, %vm566_vm13  ;;  %v629_v1 = vsel %vm581_vm6, %v484_v45, -inf  ;;  %v640_v2 = vmax.f32 %v636_v7, %v628_v56  ;;  %vm554_vm11 = vcmp.ge.s32.totalorder %v1168_v44, %v1197_v19  ;;  %vm571_vm12 = vcmp.lt.s32.totalorder %v1168_v44, %v1203_v0 }
 0x19a   : >> { %vm583_vm10 = vmand %vm550_vm15, %vm567_vm1  ;;  %v630_v3 = vsel %vm582_vm8, %v485_v53, -inf  ;;  %v641_v4 = vmax.f32 %v637_v9, %v629_v1  ;;  %vm658_vm4 = vcmp.eq.s32.totalorder %v1108_v51, %v657_v34 }
 0x19b   : >> { %vm584_vm13 = vmand %vm551_vm2, %vm568_vm3  ;;  %v631_v5 = vsel %vm583_vm10, %v486_v58, -inf  ;;  %v642_v6 = vmax.f32 %v638_v50, %v630_v3 }
 0x19c   : >> { %vm585_vm14 = vmand %vm552_vm5, %vm569_vm7  ;;  %v632_v7 = vsel %vm584_vm13, %v487_v61, -inf  ;;  %v643_v8 = vmax.f32 %v639_v59, %v631_v5 }
 0x19d   : >> { %vm586_vm15 = vmand %vm553_vm0, %vm570_vm9  ;;  %v633_v0 = vsel %vm585_vm14, %v488_v43, -inf  ;;  %v644_v9 = vmax.f32 %v640_v2, %v632_v7  ;;  %v662_v7 = vld [vmem:[#allocation6] sm:$0x7] }
 0x19e   : >> { %vm587_vm1 = vmand %vm554_vm11, %vm571_vm12  ;;  %v634_v18 = vsel %vm586_vm15, %v489_v49, -inf  ;;  %v645_v56 = vmax.f32 %v641_v4, %v633_v0 }
 0x19f   : >> { %v635_v50 = vsel %vm587_vm1, %v490_v63, -inf  ;;  %v646_v19 = vmax.f32 %v642_v6, %v634_v18 }
 0x1a0   : >> { %v647_v1 = vmax.f32 %v643_v8, %v635_v50  ;;  %v648_v3 = vmax.f32 %v644_v9, %v645_v56 }
 0x1a2   : >> { %v649_v22 = vmax.f32 %v646_v19, %v647_v1 }
 0x1a4   : >> { %v650_v25 = vmax.f32 %v648_v3, %v649_v22 }
 0x1a6   : >> { %v651_v59 = vrot.slane %v650_v25, 4 }
 0x1a8   : >> { %v652_v5 = vmax.f32 %v650_v25, %v651_v59 }
 0x1aa   : >> { %v653_v28 = vrot.slane %v652_v5, 2 }
 0x1ac   : >> { %v654_v31 = vmax.f32 %v652_v5, %v653_v28 }
 0x1ae   : >> { %v655_v37 = vrot.slane %v654_v31, 1 }
 0x1b0   : >> { %v656_v2 = vmax.f32 %v654_v31, %v655_v37 }
 0x1b1   : > { %534 = sbr.rel (!%p531_p6) target bundleno = 390 (0x186), region = 78 }
 0x1b2   : >> { %v661_v42 = vsel %vm658_vm4, %v656_v2, -inf }
 0x1b3   : >> { %v663_v4 = vmax.f32 %v662_v7, %v661_v42 }
 0x1b5   : >> { %664 = vst [vmem:[#allocation6] sm:$0x7] %v663_v4 }
 0x1b6 PF: > { %p783_p7 = scmp.eq.s32.totalorder %s959_s1, 2  ;;  %s673_s23 = sshll.u32 %s1360_s8, 4  ;;  %s674_s23 = int_to_ptr.hbm [resolvable:$true] %s673_s23 }
 0x1b7   : > { %s898_s24 = smov [#allocation6]  }
 0x1b8   : > { %s671_s25 = sshll.u32 %s898_s24, 4  ;;  %s672_s25 = int_to_ptr.vmem [resolvable:$true] %s671_s25 }
 0x1b9   : > { %780 = dma.vmem_to_hbm [thread:$0]  (%p783_p7), %s672_s25, 64, %s674_s23, [#allocation7]  }
 0x1ba   : > { %883 = dma.done.wait (%p783_p7), [#allocation7], 64  }
 0x1bb   : > { %885 = vsyncadd (%p783_p7), [#allocation7], 4294967232 }
 0x1bc PF: > { %s37_s0 = sadd.s32 1, %s888_s0  }
 0x1bd   : > { %p34_p8 = scmp.ge.s32.totalorder %s37_s0, 5  }
 0x1bf   :  { %36 = sbr.rel (!%p34_p8) target bundleno = 10 (0xa), region = 89 }
 0x1c4   :  { %687 = vsyncpa [#allocation7], 1 }
 0x1c5   :  { %689 = vsyncpa [#allocation7 + $0x1], 1 }

</bundles_post_ra>
